<compile_context>
chip_gen: v7x
topology: tpu7x:2x2x1
jax: 0.10.0
libtpu: 0.0.40
codegen_flags: <defaults>
</compile_context>

<pallas_src>
import jax
import jax.numpy as jnp
from jax.experimental import pallas as pl
from jax.experimental.pallas import tpu as pltpu


def _disc_kernel(x_ref, w1_ref, b1_ref, w2_ref, b2_ref, o_ref, acc_ref):
    """One (batch-tile, node-tile) grid step.

    x_ref : (Bt, Tn, F)   attribute tile
    w1/b1 : (F, H), (1, H)   MLP weights
    w2/b2 : (H, 1), (1, 1)   read_out weights
    o_ref : (Bt, 1, 1)       score output block (resident across node axis)
    acc_ref: (Bt, H) f32     per-batch sum-pool accumulator (VMEM scratch)
    """
    nt = pl.program_id(1)

    @pl.when(nt == 0)
    def _init():
        acc_ref[...] = jnp.zeros_like(acc_ref)

    bt, tn, f = x_ref.shape
    hd = w1_ref.shape[1]

    # ---- MLP: node-wise Linear(F -> H), f32 accumulation on the MXU ----
    if bt == 1:
        x2d = x_ref[0]                                 # (Tn, F), no relayout
        h = jnp.dot(x2d, w1_ref[...],
                    preferred_element_type=jnp.float32) + b1_ref[...]
        # ---- sum-pool over the node tile ----
        acc_ref[...] += jnp.sum(h, axis=0, keepdims=True)        # (1, H)
    else:
        x2d = x_ref[...].reshape(bt * tn, f)           # fold batch+nodes into M
        h = jnp.dot(x2d, w1_ref[...],
                    preferred_element_type=jnp.float32) + b1_ref[...]
        acc_ref[...] += h.reshape(bt, tn, hd).sum(axis=1)        # (Bt, H)

    # ---- finalize: read_out Linear(H -> 1) on the pooled features ----
    @pl.when(nt == pl.num_programs(1) - 1)
    def _finalize():
        out = jnp.dot(acc_ref[...], w2_ref[...],
                      preferred_element_type=jnp.float32) + b2_ref[...]  # (Bt, 1)
        o_ref[...] = out.reshape(o_ref.shape).astype(o_ref.dtype)


def discriminator_test(attrib, adj, params, *, bt=None, tn=None):
    """Pallas forward of Discriminator_test (node_attrib_dim != 0 path).

    `adj` is accepted for interface parity with the PyTorch forward but is
    unused on this path (exactly like the module). Returns scores of shape
    (B, 1).
    """
    del adj  # unused when node attributes are present
    B, N, F = attrib.shape
    H = params["w1"].shape[1]

    # ---- node tile: bound per-step VMEM, keep it sublane-aligned ----
    if tn is None:
        tn = N
        if N > 512:
            for cand in (512, 256, 128, 64, 32, 16, 8):
                if N % cand == 0:
                    tn = cand
                    break
    assert N % tn == 0, "node count must be divisible by the node tile"

    # ---- batch tile: keep >= 2 parallel grid steps (v7x megacore) while
    #      folding enough rows into M to amortize per-step overhead ----
    if bt is None:
        bt = 1
        for cand in range(2, B + 1):
            if B % cand:
                continue
            if B >= 2 and B // cand < 2:
                break
            if cand * tn > 2048:
                break
            bt = cand
    assert B % bt == 0, "batch must be divisible by the batch tile"

    grid = (B // bt, N // tn)

    full = lambda shape: pl.BlockSpec(shape, lambda b, n: (0,) * len(shape))

    out3 = pl.pallas_call(
        _disc_kernel,
        out_shape=jax.ShapeDtypeStruct((B, 1, 1), attrib.dtype),
        grid=grid,
        in_specs=[
            pl.BlockSpec((bt, tn, F), lambda b, n: (b, n, 0)),   # attrib tile
            full((F, H)),                                         # MLP weight
            full((1, H)),                                         # MLP bias
            full((H, 1)),                                         # read_out weight
            full((1, 1)),                                         # read_out bias
        ],
        out_specs=pl.BlockSpec((bt, 1, 1), lambda b, n: (b, 0, 0)),
        scratch_shapes=[pltpu.VMEM((bt, H), jnp.float32)],
        compiler_params=pltpu.CompilerParams(
            dimension_semantics=("parallel", "arbitrary")),
    )(attrib, params["w1"], params["b1"], params["w2"], params["b2"])

    return out3.reshape(B, 1)


def discriminator_reference(attrib, params):
    """Pure-JAX reference (matches the PyTorch forward)."""
    h = jnp.einsum("bnf,fh->bnh", attrib, params["w1"]) + params["b1"]   # MLP
    pooled = h.sum(axis=-2)                                              # sum over nodes
    return pooled @ params["w2"] + params["b2"]                          # read_out


def init_params(key, fin, hidden=64):
    k1, k2, k3, k4 = jax.random.split(key, 4)
    return {
        "w1": jax.random.normal(k1, (fin, hidden), jnp.float32) * 0.1,
        "b1": jax.random.normal(k2, (1, hidden), jnp.float32) * 0.1,
        "w2": jax.random.normal(k3, (hidden, 1), jnp.float32) * 0.1,
        "b2": jax.random.normal(k4, (1, 1), jnp.float32) * 0.1,
    }


if __name__ == "__main__":
    B, N, F = 2, 16, 32      # batch, nodes, node_attrib_dim
    key = jax.random.PRNGKey(0)
    kx, ka, kp = jax.random.split(key, 3)

    attrib = jax.random.normal(kx, (B, N, F), jnp.float32)
    # dense symmetric 0/1 adjacency (unused on the attrib path, kept for parity)
    a_raw = (jax.random.uniform(ka, (B, N, N)) > 0.7).astype(jnp.float32)
    adj = jnp.maximum(a_raw, jnp.swapaxes(a_raw, -1, -2)) * (1.0 - jnp.eye(N))

    params = init_params(kp, F, hidden=64)

    out = discriminator_test(attrib, adj, params)
    out = jax.block_until_ready(out)

    ref = discriminator_reference(attrib, params)
    assert out.shape == (B, 1), f"bad output shape {out.shape}"
    assert jnp.allclose(out, ref, atol=1e-4, rtol=1e-4), "mismatch vs reference"

    print("KERNEL_OK")
</pallas_src>

<mosaic_0001>
module attributes {stable_mosaic.version = 11 : i64} {
  func.func @_disc_kernel(%arg0: i32, %arg1: i32, %arg2: memref<1x16x32xf32, #tpu.memory_space<vmem>>, %arg3: memref<32x64xf32, #tpu.memory_space<vmem>>, %arg4: memref<1x64xf32, #tpu.memory_space<vmem>>, %arg5: memref<64x1xf32, #tpu.memory_space<vmem>>, %arg6: memref<1x1xf32, #tpu.memory_space<vmem>>, %arg7: memref<1x1x1xf32, #tpu.memory_space<vmem>>, %arg8: memref<1x64xf32, #tpu.memory_space<vmem>>) attributes {dimension_semantics = [#tpu.dimension_semantics<parallel>, #tpu.dimension_semantics<arbitrary>], iteration_bounds = array<i64: 2, 1>, scalar_prefetch = 0 : i64, scratch_operands = 1 : i64, tpu.core_type = #tpu.core_type<tc>, window_params = [{transform_indices = @transform_0, window_bounds = array<i64: 1, 16, 32>}, {pipeline_mode = #tpu.pipeline_mode<synchronous>, transform_indices = @transform_1, window_bounds = array<i64: 32, 64>}, {pipeline_mode = #tpu.pipeline_mode<synchronous>, transform_indices = @transform_2, window_bounds = array<i64: 1, 64>}, {pipeline_mode = #tpu.pipeline_mode<synchronous>, transform_indices = @transform_3, window_bounds = array<i64: 64, 1>}, {pipeline_mode = #tpu.pipeline_mode<synchronous>, transform_indices = @transform_4, window_bounds = array<i64: 1, 1>}, {transform_indices = @transform_5, window_bounds = array<i64: 1, 1, 1>}]} {
    %c0_i32 = arith.constant 0 : i32
    %0 = arith.cmpi eq, %arg1, %c0_i32 : i32
    %1 = arith.extui %0 : i1 to i32
    %c0_i32_0 = arith.constant 0 : i32
    %2 = arith.cmpi ne, %1, %c0_i32_0 : i32
    scf.if %2 {
      %cst_14 = arith.constant 0.000000e+00 : f32
      %18 = vector.broadcast %cst_14 : f32 to vector<1x64xf32>
      %c0_15 = arith.constant 0 : index
      %c0_16 = arith.constant 0 : index
      %19 = vector.load %arg8[%c0_15, %c0_16] : memref<1x64xf32, #tpu.memory_space<vmem>>, vector<1x64xf32>
      tpu.vector_store %arg8[%c0_15, %c0_16], %18 {strides = array<i32>} : memref<1x64xf32, #tpu.memory_space<vmem>>, vector<1x64xf32>,
    } else {
    }
    %c0 = arith.constant 0 : index
    %c0_1 = arith.constant 0 : index
    %c0_2 = arith.constant 0 : index
    %3 = vector.load %arg2[%c0, %c0_1, %c0_2] : memref<1x16x32xf32, #tpu.memory_space<vmem>>, vector<1x16x32xf32>
    %4 = vector.shape_cast %3 : vector<1x16x32xf32> to vector<16x32xf32>
    %c0_3 = arith.constant 0 : index
    %c0_4 = arith.constant 0 : index
    %5 = vector.load %arg3[%c0_3, %c0_4] : memref<32x64xf32, #tpu.memory_space<vmem>>, vector<32x64xf32>
    %cst = arith.constant dense<0.000000e+00> : vector<16x64xf32>
    %6 = tpu.matmul %4, %5, %cst {dimension_numbers = #tpu.dot_dimension_numbers<[1], [0], [0], [1], [0, 0, 1, 1], [], []>} : vector<16x32xf32>, vector<32x64xf32>, vector<16x64xf32> -> vector<16x64xf32>
    %c0_5 = arith.constant 0 : index
    %c0_6 = arith.constant 0 : index
    %7 = vector.load %arg4[%c0_5, %c0_6] : memref<1x64xf32, #tpu.memory_space<vmem>>, vector<1x64xf32>
    %8 = vector.broadcast %7 : vector<1x64xf32> to vector<16x64xf32>
    %9 = arith.addf %6, %8 : vector<16x64xf32>
    %c0_7 = arith.constant 0 : index
    %c0_8 = arith.constant 0 : index
    %10 = vector.load %arg8[%c0_7, %c0_8] : memref<1x64xf32, #tpu.memory_space<vmem>>, vector<1x64xf32>
    %cst_9 = arith.constant dense<0.000000e+00> : vector<64xf32>
    %11 = vector.multi_reduction <add>, %9, %cst_9 [0] : vector<16x64xf32> to vector<64xf32>
    %12 = vector.shape_cast %11 : vector<64xf32> to vector<1x64xf32>
    %13 = arith.addf %10, %12 : vector<1x64xf32>
    %c0_10 = arith.constant 0 : index
    %c0_11 = arith.constant 0 : index
    %14 = vector.load %arg8[%c0_10, %c0_11] : memref<1x64xf32, #tpu.memory_space<vmem>>, vector<1x64xf32>
    tpu.vector_store %arg8[%c0_10, %c0_11], %13 {strides = array<i32>} : memref<1x64xf32, #tpu.memory_space<vmem>>, vector<1x64xf32>,
    %c0_i32_12 = arith.constant 0 : i32
    %15 = arith.cmpi eq, %arg1, %c0_i32_12 : i32
    %16 = arith.extui %15 : i1 to i32
    %c0_i32_13 = arith.constant 0 : i32
    %17 = arith.cmpi ne, %16, %c0_i32_13 : i32
    scf.if %17 {
      %c0_14 = arith.constant 0 : index
      %c0_15 = arith.constant 0 : index
      %18 = vector.load %arg8[%c0_14, %c0_15] : memref<1x64xf32, #tpu.memory_space<vmem>>, vector<1x64xf32>
      %c0_16 = arith.constant 0 : index
      %c0_17 = arith.constant 0 : index
      %19 = vector.load %arg5[%c0_16, %c0_17] : memref<64x1xf32, #tpu.memory_space<vmem>>, vector<64x1xf32>
      %cst_18 = arith.constant dense<0.000000e+00> : vector<1x1xf32>
      %20 = tpu.matmul %18, %19, %cst_18 {dimension_numbers = #tpu.dot_dimension_numbers<[1], [0], [0], [1], [0, 0, 1, 1], [], []>} : vector<1x64xf32>, vector<64x1xf32>, vector<1x1xf32> -> vector<1x1xf32>
      %c0_19 = arith.constant 0 : index
      %c0_20 = arith.constant 0 : index
      %21 = vector.load %arg6[%c0_19, %c0_20] : memref<1x1xf32, #tpu.memory_space<vmem>>, vector<1x1xf32>
      %22 = arith.addf %20, %21 : vector<1x1xf32>
      %23 = vector.shape_cast %22 : vector<1x1xf32> to vector<1x1x1xf32>
      %c0_21 = arith.constant 0 : index
      %c0_22 = arith.constant 0 : index
      %c0_23 = arith.constant 0 : index
      %24 = vector.load %arg7[%c0_21, %c0_22, %c0_23] : memref<1x1x1xf32, #tpu.memory_space<vmem>>, vector<1x1x1xf32>
      tpu.vector_store %arg7[%c0_21, %c0_22, %c0_23], %23 {strides = array<i32>} : memref<1x1x1xf32, #tpu.memory_space<vmem>>, vector<1x1x1xf32>,
    } else {
    }
    return
  }
  func.func @transform_0(%arg0: i32, %arg1: i32) -> (i32, i32, i32) {
    %c0_i32 = arith.constant 0 : i32
    %c0_i32_0 = arith.constant 0 : i32
    return %arg0, %arg1, %c0_i32 : i32, i32, i32
  }
  func.func @transform_1(%arg0: i32, %arg1: i32) -> (i32, i32) {
    %c0_i32 = arith.constant 0 : i32
    %c0_i32_0 = arith.constant 0 : i32
    %c0_i32_1 = arith.constant 0 : i32
    return %c0_i32, %c0_i32_0 : i32, i32
  }
  func.func @transform_2(%arg0: i32, %arg1: i32) -> (i32, i32) {
    %c0_i32 = arith.constant 0 : i32
    %c0_i32_0 = arith.constant 0 : i32
    %c0_i32_1 = arith.constant 0 : i32
    return %c0_i32, %c0_i32_0 : i32, i32
  }
  func.func @transform_3(%arg0: i32, %arg1: i32) -> (i32, i32) {
    %c0_i32 = arith.constant 0 : i32
    %c0_i32_0 = arith.constant 0 : i32
    %c0_i32_1 = arith.constant 0 : i32
    return %c0_i32, %c0_i32_0 : i32, i32
  }
  func.func @transform_4(%arg0: i32, %arg1: i32) -> (i32, i32) {
    %c0_i32 = arith.constant 0 : i32
    %c0_i32_0 = arith.constant 0 : i32
    %c0_i32_1 = arith.constant 0 : i32
    return %c0_i32, %c0_i32_0 : i32, i32
  }
  func.func @transform_5(%arg0: i32, %arg1: i32) -> (i32, i32, i32) {
    %c0_i32 = arith.constant 0 : i32
    %c0_i32_0 = arith.constant 0 : i32
    %c0_i32_1 = arith.constant 0 : i32
    return %arg0, %c0_i32, %c0_i32_0 : i32, i32, i32
  }
}

</mosaic_0001>

<bundles_post_ra>
// kernel: tpu_custom_call.1
= control target key start
LH: loop header
LB: loop body
LE: loop exit
PB: predicated region body
PF: predicated region fallthrough
CT: control target
= control target key end

     0   :  { %s681_s20 = smov 0   ;;  %s683_s21 = smov 0   ;;  %s762_s0 = inlined_call_operand.vmem [shape: f32[2,16,32], index: 0, kind: input, shape index: {}]   ;;  %s763_s1 = inlined_call_operand.vmem [shape: f32[32,64], index: 1, kind: input, shape index: {}]   ;;  %s764_s2 = inlined_call_operand.vmem [shape: f32[1,64], index: 2, kind: input, shape index: {}]   ;;  %s765_s3 = inlined_call_operand.vmem [shape: f32[64,1], index: 3, kind: input, shape index: {}]   ;;  %s766_s4 = inlined_call_operand.<no memory space> [shape: f32[1,1], index: 4, kind: input, shape index: {}]   ;;  %s767_s5 = inlined_call_operand.vmem [shape: f32[2,1,1], index: 5, kind: output, shape index: {}]  }
   0x1   :  { %v10_v0 = vstv %s766_s4  ;;  %s685_s22 = smov 0  }
   0x2   :  { %11 = vst [vmem:[#allocation3] sm:$0x1] %v10_v0 }
   0x3 LB: > { %s29_s4 = sadd.s32 1, %s639_s21  ;;  %p519_p0 = scmp.ge.s32.totalorder %s643_s22, 1  ;;  %s643_s22 = sphi %s685_s22, %s17_s22   ;;  %s639_s21 = sphi %s683_s21, %s769_s21   ;;  %s635_s20 = sphi %s681_s20, %s768_s20  }
   0x4   : > { %p31_p1 = scmp.ge.s32.totalorder %s29_s4, 2  ;;  %p208_p2 = scmp.lt.s32.totalorder %s643_s22, 3 }
   0x6   : > { %s771_s4 = smov (%p31_p1, %s29_s4), 0  ;;  %p209_p3 = pnand %p519_p0, %p208_p2 }
   0x7   : > { %v259_v1 = vld [vmem:[%s763_s1] sm:$0xff] (!%p209_p3)  ;;  %v260_v2 = vld [vmem:[%s763_s1 + $0x8] sm:$0xff] (!%p209_p3)  ;;  %v261_v3 = vld [vmem:[%s763_s1 + $0x10] sm:$0xff] (!%p209_p3)  ;;  %p239_p4 = scmp.lt.s32.totalorder (!%p209_p3), %s635_s20, 1  ;;  %vm270_vm0 = vcmask (!%p209_p3), 261120   ;;  %vm255_vm1 = vcmask (!%p209_p3), 516096  }
   0x8   : > { %212 = sbr.rel (%p209_p3) target bundleno = 475 (0x1db), region = 40  ;;  %v574_v4 = vpack.c.bf16 (!%p209_p3), %v260_v2, %v259_v1  ;;  %v262_v5 = vld [vmem:[%s763_s1 + $0x18] sm:$0xff] (!%p209_p3)  ;;  %v370_v9 = vld [vmem:[%s765_s3] sm:$0xff] (!%p209_p3)  ;;  %v371_v10 = vld [vmem:[%s765_s3 + $0x8] sm:$0xff] (!%p209_p3)  ;;  %v645_v11 = vmov (!%p209_p3), 0.0   ;;  %v646_v13 = vmov (!%p209_p3), 0.0|0.0  }
   0x9   : > { %v578_v6 = vpack.c.bf16 (!%p209_p3), %v262_v5, %v261_v3  ;;  %256 = vst.msk [vmem:[#allocation2] sm:$0x1] (!%p209_p3), %vm255_vm1, %v645_v11  ;;  %v583_v12 = vpack.c.bf16 (!%p209_p3), %v371_v10, %v370_v9  ;;  %582 = vmatprep.subr.bf16.mxu1 (!%p209_p3), %v646_v13  ;;  %v372_v14 = vld [vmem:[%s765_s3 + $0x10] sm:$0xff] (!%p209_p3)  ;;  %v373_v15 = vld [vmem:[%s765_s3 + $0x18] sm:$0xff] (!%p209_p3)  ;;  %v374_v17 = vld [vmem:[%s765_s3 + $0x20] sm:$0xff] (!%p209_p3)  ;;  %vm647_vm2 = vmmov (!%p209_p3), 0  }
   0xa   : > { %575 = vmatprep.subr.bf16.mxu0 (!%p209_p3), %v574_v4  ;;  %v586_v16 = vpack.c.bf16 (!%p209_p3), %v373_v15, %v372_v14  ;;  %v375_v18 = vld [vmem:[%s765_s3 + $0x28] sm:$0xff] (!%p209_p3)  ;;  %v376_v20 = vld [vmem:[%s765_s3 + $0x30] sm:$0xff] (!%p209_p3)  ;;  %v377_v21 = vld [vmem:[%s765_s3 + $0x38] sm:$0xff] (!%p209_p3)  ;;  %571 = vmatprep.mubr.msk.f32.mxu1 (!%p209_p3), %vm647_vm2, %v645_v11  ;;  %vm353_vm3 = vcmask (!%p209_p3), 523264   ;;  %vm452_vm4 = vcmask (!%p209_p3), 0  }
   0xb   : > { %577 = vmatpush3.bf16.msra.mxu0 (!%p209_p3), %v574_v4  ;;  %584 = vmatpush3.bf16.msra.mxu1 (!%p209_p3), %v583_v12  ;;  %v589_v19 = vpack.c.bf16 (!%p209_p3), %v375_v18, %v374_v17  ;;  %v592_v22 = vpack.c.bf16 (!%p209_p3), %v377_v21, %v376_v20  ;;  %v522_v23 = vld [vmem:[%s764_s2] ss:$0 sm:$0xff] (!%p209_p3)  ;;  %v378_v40 = vld [vmem:[#allocation3] sm:$0x1] (!%p209_p3) }
   0xc   : > { %579 = vmatprep.subr.bf16.mxu0 (!%p209_p3), %v578_v6  ;;  %585 = vmatprep.subr.bf16.mxu1 (!%p209_p3), %v646_v13 }
   0xf   : > { %s773_s20 = smov (!%p239_p4, %s635_s20), 1  ;;  %581 = vmatpush3.bf16.msra.mxu0 %v578_v6  ;;  %587 = vmatpush3.bf16.msra.mxu1 %v586_v16 }
  0x10   : > { %s528_s6 = sshll.u32 %s773_s20, 4  ;;  %588 = vmatprep.subr.bf16.mxu1 %v646_v13  ;;  %v352_v36 = vld [vmem:[#allocation2] sm:$0x1]  ;;  %s250_s8 = scalar_lea.vmem %s767_s5, %s773_s20 }
  0x11   : > { %s246_s9 = scalar_lea.vmem %s762_s0, %s528_s6 }
  0x12   : > { %v257_v7 = vld [vmem:[%s246_s9] sm:$0xff]  ;;  %v258_v8 = vld [vmem:[%s246_s9 + $0x8] sm:$0xff] }
  0x13   : > { %552 = vmatprep.mubr.msk.f32.mxu0 %vm270_vm0, %v257_v7  ;;  %590 = vmatpush3.bf16.msra.mxu1 %v589_v19 }
  0x14   : > { %553 = vmatmul.mubr.msk.f32.vlgmr.msra.gmra.mrb[0].mxu0 %vm270_vm0, %v258_v8  ;;  %591 = vmatprep.subr.bf16.mxu1 %v646_v13 }
  0x17   : > { %593 = vmatpush3.bf16.msra.mxu1 %v592_v22 }
  0xe7   : > { %v554_v24 = vpop.f32.mrb[0].mxu0 }
  0xe8   : > { %v349_v25 = vadd.f32 %v554_v24, %v522_v23  ;;  %v343_v26 = vpop.f32.mrb[1].mxu0 }
  0xe9   : > { %v344_v27 = vadd.f32 %v522_v23, %v343_v26 }
  0xea   : > { %v355_v28 = vsel %vm353_vm3, %v349_v25, 0.0 }
  0xeb   : > { %v354_v29 = vsel %vm353_vm3, %v344_v27, 0.0 }
  0xec   : > { %v356_v30 = vadd.f32 %v355_v28, %v354_v29 }
  0xee   : > { %v357_v31 = vrot.slane %v356_v30, 4 }
  0xf0   : > { %v358_v32 = vadd.f32 %v357_v31, %v356_v30 }
  0xf2   : > { %v359_v33 = vrot.slane %v358_v32, 2 }
  0xf4   : > { %v360_v34 = vadd.f32 %v359_v33, %v358_v32 }
  0xf6   : > { %v361_v35 = vrot.slane %v360_v34, 1 }
  0xf8   : > { %v362_v37 = vadd.f32 %v361_v35, %v360_v34 }
  0xfa   : > { %v363_v38 = vadd.f32 %v362_v37, %v352_v36 }
  0xfc   : > { %365 = vst.msk [vmem:[#allocation2] sm:$0x1] %vm255_vm1, %v363_v38 }
 0x103   : > { %v369_v39 = vld [vmem:[#allocation2] sm:$0x1] }
 0x104   : > { %572 = vmatmul.mubr.msk.f32.vlgmr.msra.gmra.mrb[0].mxu1 %vm353_vm3, %v369_v39 }
 0x1d7   : > { %v448_v41 = vpop.f32.mrb[0].mxu1 }
 0x1d8   : > { %v449_v42 = vadd.f32 %v448_v41, %v378_v40  ;;  %v573_v43 = vpop.f32.mrb[1].mxu1 }
 0x1da   : > { %453 = vst.msk [vmem:[%s250_s8] sm:$0x1] %vm452_vm4, %v449_v42 }
 0x1db PF: > { %s17_s22 = sadd.s32 1, %s643_s22   ;;  %s768_s20 = smov %s639_s21 }
 0x1dc   : > { %p14_p5 = scmp.ge.s32.totalorder %s17_s22, 4   ;;  %s769_s21 = smov %s771_s4 }
 0x1de   :  { %16 = sbr.rel (!%p14_p5) target bundleno = 3 (0x3), region = 78 }

</bundles_post_ra>
